<compile_context>
chip_gen: v6e
topology: v6e:2x2x1
jax: 0.10.0
libtpu: 0.0.40
codegen_flags: <defaults>
</compile_context>

<pallas_src>
import math

import jax
import jax.numpy as jnp
import numpy as np
from jax.experimental import pallas as pl
from jax.experimental.pallas import tpu as pltpu


def _spatial_dropout_kernel(x_ref, noise_ref, o_ref):
    """One grid step: one (1, TS, Hp) tile of one batch element.

    x_ref     : (1, TS, Hp) VMEM tile of the (possibly lane-packed) input
    noise_ref : (1, 1, Hp)  per-batch noise row   (streamed noise spec), or
                (B, 1, Hp)  whole noise array     (resident noise spec)
    o_ref     : (1, TS, Hp) VMEM tile of the output
    """
    if noise_ref.shape[0] == 1:
        noise = noise_ref[...]                           # (1, 1, Hp)
    else:
        noise = noise_ref[pl.ds(pl.program_id(0), 1)]    # (1, 1, Hp) current batch
    # noise stays f32 (unquantized scale); multiply upcasts, cast back to x dtype.
    o_ref[...] = (x_ref[...] * noise).astype(o_ref.dtype)


def _sublane_multiple(itemsize):
    # f32 native tile is (8,128); bf16 packs to (16,128); int8/fp8 to (32,128).
    if itemsize >= 4:
        return 8
    if itemsize == 2:
        return 16
    return 32


def _lane_pack_factor(S, H):
    """Smallest k with (k*H) % 128 == 0 and S % k == 0; 1 if none exists."""
    if H % 128 == 0:
        return 1
    k0 = 128 // math.gcd(H, 128)
    k = k0
    while k <= S:
        if S % k == 0:
            return k
        k += k0
    return 1  # fall back to masked stores (still correct)


def _vmem_budget():
    """(buffer_budget_bytes, vmem_capacity_bytes) for the 2-in + 2-out buffers."""
    try:
        cap = int(pltpu.get_tpu_info().vmem_capacity_bytes)
    except Exception:
        cap = 64 * 1024 * 1024            # conservative fallback (v7x per-TC size)
    budget = min(24 << 20, cap // 4)      # ~24 MiB on v5e/v6e, ~16 MiB on v7x
    return budget, cap


def _pick_seq_tile(S, row_bytes, sub, budget_bytes):
    """Largest seq tile (multiple of `sub`, or S itself) whose 2-in + 2-out
    double-buffered footprint stays inside `budget_bytes`."""
    max_rows = max(sub, int(budget_bytes) // max(1, 4 * row_bytes))
    if S <= max_rows:
        return S
    return int(max(sub, (max_rows // sub) * sub))


def spatial_dropout(x, drop=0.5, *, key=None, seed=0, training=True,
                    noise_resident=None):
    """Pallas SpatialDropout forward.  x: (B, S, H).

    NOTE: pass a fresh `key` (or new `seed`) on every call; reusing the
    default seed reuses the same dropout mask across steps/layers.
    """
    if (not training) or drop == 0.0:
        return x
    if drop == 1.0:
        return jnp.zeros_like(x)

    B, S, H = x.shape
    keep_prob = 1.0 - float(drop)

    if key is None:
        key = jax.random.PRNGKey(seed)
    # Tiny (B, 1, H) mask, drawn outside the kernel (portable, negligible cost).
    keep = jax.random.bernoulli(key, p=keep_prob, shape=(B, 1, H))
    noise = keep.astype(jnp.float32) * jnp.float32(1.0 / keep_prob)

    # Lane-dense layout: pack k consecutive seq rows into the lane dim when H
    # is not a multiple of 128 (mask is constant along seq, so this is exact).
    k = _lane_pack_factor(S, H)
    Sp, Hp = S // k, k * H
    xk = x if k == 1 else x.reshape(B, Sp, Hp)
    noisek = noise if k == 1 else jnp.tile(noise, (1, 1, k))

    itemsize = jnp.dtype(x.dtype).itemsize
    sub = _sublane_multiple(itemsize)
    budget, cap = _vmem_budget()
    TS = _pick_seq_tile(Sp, Hp * itemsize, sub, budget)
    grid = (B, pl.cdiv(Sp, TS))

    noise_bytes = B * Hp * 4
    if noise_resident is None:
        noise_resident = noise_bytes <= (256 << 10)
    if noise_resident:
        noise_spec = pl.BlockSpec((B, 1, Hp), lambda b, s: (0, 0, 0))
    else:
        noise_spec = pl.BlockSpec((1, 1, Hp), lambda b, s: (b, 0, 0))

    # 2 in + 2 out x/out buffers + (double-buffered) noise + headroom.
    vmem_limit = min(cap // 2,
                     max(16 << 20,
                         4 * TS * Hp * itemsize + 2 * noise_bytes + (4 << 20)))

    cost = pl.CostEstimate(
        flops=B * S * H,
        transcendentals=0,
        bytes_accessed=2 * B * S * H * itemsize + noise_bytes,
    )

    out = pl.pallas_call(
        _spatial_dropout_kernel,
        out_shape=jax.ShapeDtypeStruct((B, Sp, Hp), x.dtype),
        grid_spec=pltpu.PrefetchScalarGridSpec(
            num_scalar_prefetch=0,
            grid=grid,
            in_specs=[
                pl.BlockSpec((1, TS, Hp), lambda b, s: (b, s, 0)),   # x tile
                noise_spec,                                          # noise
            ],
            out_specs=pl.BlockSpec((1, TS, Hp), lambda b, s: (b, s, 0)),
        ),
        compiler_params=pltpu.CompilerParams(
            # every (batch, seq-tile) block is fully independent
            dimension_semantics=("parallel", "parallel"),
            vmem_limit_bytes=int(vmem_limit),
        ),
        cost_estimate=cost,
    )(xk, noisek)

    return out if k == 1 else out.reshape(B, S, H)


if __name__ == "__main__":
    drop = 0.5
    keep_prob = 1.0 - drop

    def reference(x, drop, seed):
        B, _, H = x.shape
        keep = jax.random.bernoulli(jax.random.PRNGKey(seed),
                                    p=1.0 - drop, shape=(B, 1, H))
        noise = keep.astype(jnp.float32) * jnp.float32(1.0 / (1.0 - drop))
        return (x.astype(jnp.float32) * noise).astype(x.dtype)

    # Case 1: f32, H=32 (not a multiple of 128) -> lane-packing + resident noise.
    x = jax.random.normal(jax.random.PRNGKey(0), (2, 8, 32), dtype=jnp.float32)
    out = jax.block_until_ready(spatial_dropout(x, drop=drop, seed=0, training=True))
    assert out.shape == x.shape and out.dtype == x.dtype
    np.testing.assert_allclose(np.asarray(out),
                               np.asarray(reference(x, drop, 0)), atol=1e-6)

    # Case 2: bf16, H=128 (lane-dense already) -> streamed per-batch noise path.
    xb = jax.random.normal(jax.random.PRNGKey(1), (2, 16, 128), dtype=jnp.bfloat16)
    outb = jax.block_until_ready(
        spatial_dropout(xb, drop=drop, seed=3, training=True, noise_resident=False))
    assert outb.shape == xb.shape and outb.dtype == xb.dtype
    np.testing.assert_allclose(np.asarray(outb, dtype=np.float32),
                               np.asarray(reference(xb, drop, 3), dtype=np.float32),
                               atol=1e-2)

    # Eval mode / drop==0 are identity; drop==1 is all zeros.
    x_np = np.asarray(x)
    assert np.array_equal(np.asarray(spatial_dropout(x, drop=drop, training=False)), x_np)
    assert np.array_equal(np.asarray(spatial_dropout(x, drop=0.0, training=True)), x_np)
    assert np.array_equal(np.asarray(spatial_dropout(x, drop=1.0, training=True)),
                          np.zeros_like(x_np))

    print("KERNEL_OK")
</pallas_src>

<mosaic_0001>
module attributes {stable_mosaic.version = 11 : i64} {
  func.func @_spatial_dropout_kernel(%arg0: i32, %arg1: i32, %arg2: memref<1x2x128xf32, #tpu.memory_space<vmem>>, %arg3: memref<2x1x128xf32, #tpu.memory_space<vmem>>, %arg4: memref<1x2x128xf32, #tpu.memory_space<vmem>>) attributes {dimension_semantics = [#tpu.dimension_semantics<parallel>, #tpu.dimension_semantics<parallel>], iteration_bounds = array<i64: 2, 1>, scalar_prefetch = 0 : i64, scratch_operands = 0 : i64, tpu.core_type = #tpu.core_type<tc>, window_params = [{transform_indices = @transform_0, window_bounds = array<i64: 1, 2, 128>}, {pipeline_mode = #tpu.pipeline_mode<synchronous>, transform_indices = @transform_1, window_bounds = array<i64: 2, 1, 128>}, {transform_indices = @transform_2, window_bounds = array<i64: 1, 2, 128>}]} {
    %0 = arith.index_cast %arg0 : i32 to index
    %c0 = arith.constant 0 : index
    %c0_0 = arith.constant 0 : index
    %1 = vector.load %arg3[%0, %c0, %c0_0] : memref<2x1x128xf32, #tpu.memory_space<vmem>>, vector<1x1x128xf32>
    %c0_1 = arith.constant 0 : index
    %c0_2 = arith.constant 0 : index
    %c0_3 = arith.constant 0 : index
    %2 = vector.load %arg2[%c0_1, %c0_2, %c0_3] : memref<1x2x128xf32, #tpu.memory_space<vmem>>, vector<1x2x128xf32>
    %3 = vector.broadcast %1 : vector<1x1x128xf32> to vector<1x2x128xf32>
    %4 = arith.mulf %2, %3 : vector<1x2x128xf32>
    %c0_4 = arith.constant 0 : index
    %c0_5 = arith.constant 0 : index
    %c0_6 = arith.constant 0 : index
    %5 = vector.load %arg4[%c0_4, %c0_5, %c0_6] : memref<1x2x128xf32, #tpu.memory_space<vmem>>, vector<1x2x128xf32>
    tpu.vector_store %arg4[%c0_4, %c0_5, %c0_6], %4 {strides = array<i32>} : memref<1x2x128xf32, #tpu.memory_space<vmem>>, vector<1x2x128xf32>,
    return
  }
  func.func @transform_0(%arg0: i32, %arg1: i32) -> (i32, i32, i32) {
    %c0_i32 = arith.constant 0 : i32
    %c0_i32_0 = arith.constant 0 : i32
    return %arg0, %arg1, %c0_i32 : i32, i32, i32
  }
  func.func @transform_1(%arg0: i32, %arg1: i32) -> (i32, i32, i32) {
    %c0_i32 = arith.constant 0 : i32
    %c0_i32_0 = arith.constant 0 : i32
    %c0_i32_1 = arith.constant 0 : i32
    %c0_i32_2 = arith.constant 0 : i32
    return %c0_i32, %c0_i32_0, %c0_i32_1 : i32, i32, i32
  }
  func.func @transform_2(%arg0: i32, %arg1: i32) -> (i32, i32, i32) {
    %c0_i32 = arith.constant 0 : i32
    %c0_i32_0 = arith.constant 0 : i32
    return %arg0, %arg1, %c0_i32 : i32, i32, i32
  }
}

</mosaic_0001>

<bundles_post_ra>
// kernel: tpu_custom_call.1
= control target key start
LH: loop header
LB: loop body
LE: loop exit
PB: predicated region body
PF: predicated region fallthrough
CT: control target
= control target key end

     0   :  { %7 = vsyncpa [#allocation3], 0  ;;  %s727_s0 = inlined_call_operand.hbm [shape: f32[2,2,128], index: 0, kind: input, shape index: {}]   ;;  %s728_s1 = inlined_call_operand.hbm [shape: f32[2,1,128], index: 1, kind: input, shape index: {}]   ;;  %s729_s2 = inlined_call_operand.hbm [shape: f32[2,2,128], index: 2, kind: output, shape index: {}]  }
   0x1   :  { %9 = vsyncpa [#allocation3 + $0x1], 0 }
   0x2   :  { %10 = vsyncpa [#allocation6], 0 }
   0x3   :  { %11 = vsyncpa [#allocation4], 0 }
   0x4   :  { %13 = vsyncpa [#allocation4 + $0x1], 0  ;;  %s559_s9 = smov 0   ;;  %s561_s10 = smov 0  }
   0x5   :  { %s563_s11 = smov 0   ;;  %s565_s12 = smov 0  }
   0x6   :  { %s567_s13 = smov 0   ;;  %s569_s14 = smov 0  }
   0x7 LB: > { %s308_s15 = sadd.s32 4294967295, %s537_s14   ;;  %s309_s16 = sadd.s32 4294967294, %s537_s14   ;;  %s537_s14 = sphi %s569_s14, %s19_s14   ;;  %s533_s13 = sphi %s567_s13, %s747_s13   ;;  %s529_s12 = sphi %s565_s12, %s746_s12   ;;  %s525_s11 = sphi %s563_s11, %s745_s11   ;;  %s521_s10 = sphi %s561_s10, %s744_s10   ;;  %s517_s9 = sphi %s559_s9, %s743_s9  }
   0x8   : > { %p53_p0 = scmp.ne.s32.totalorder %s521_s10, %s517_s9  ;;  %p593_p1 = scmp.eq.s32.totalorder %s308_s15, 0 }
   0x9   : > { %p597_p2 = scmp.eq.s32.totalorder %s308_s15, 1  ;;  %p106_p3 = scmp.eq.s32.totalorder %s309_s16, 1 }
   0xa   : > { %p603_p4 = por %p593_p1, %p53_p0  ;;  %p310_p5 = scmp.ge.s32.totalorder %s537_s14, 1 }
   0xb   : > { %p608_p6 = por %p106_p3, %p53_p0  ;;  %p113_p7 = scmp.lt.s32.totalorder %s537_s14, 3 }
   0xc   : > { %s733_s19 = scalar_select %p603_p4, 1, 0 }
   0xd   : > { %s734_s20 = scalar_select %p608_p6, 1, 0 }
   0xe   : > { %p613_p8 = pnand %p310_p5, %p113_p7  ;;  %s539_s22 = smov [#allocation5]  }
   0xf   : > { %s125_s23 = sshll.u32 %s539_s22, 4  ;;  %s31_s25 = sadd.s32 1, %s533_s13  ;;  %s126_s23 = int_to_ptr.vmem [resolvable:$true] %s125_s23 }
  0x10   : > { %p332_p9 = pneg %p613_p8  ;;  %s410_s26 = scalar_lea.vmem %s126_s23, 32 }
  0x11   : > { %p411_p13 = scmp.ne.s32.totalorder %s126_s23, %s410_s26  ;;  %p418_p5 = scmp.lt.s32.totalorder %s126_s23, %s126_s23 }
  0x12   : > { %p622_p11 = pnand %p332_p9, %p593_p1  ;;  %p419_p7 = scmp.lt.s32.totalorder %s410_s26, %s410_s26 }
  0x14   : > { %p401_p12 = pneg %p622_p11  ;;  %p420_p6 = por %p419_p7, %p418_p5 }
  0x16   : > { %p413_p0 = pnand %p411_p13, %p401_p12 }
  0x18   : > { %p414_p3 = pneg %p413_p0 }
  0x1a   : > { %p421_p4 = pnand %p420_p6, %p414_p3 }
  0x1c   : > { %424 = shalt.err (!%p421_p4)
}
  0x1d   : > { %s540_s27 = smov 16   ;;  %s541_s28 = smov 1  }
  0x1e   : > { %335 = dma.hbm_to_vmem [thread:$0]  (!%p622_p11), %s728_s1, 32, %s126_s23, [#allocation6], %s540_s27, %s540_s27, %s541_s28  }
  0x1f   : > { %p33_p6 = scmp.ge.s32.totalorder %s31_s25, 2  ;;  %s40_s3 = sadd.s32 1, %s525_s11 }
  0x20   : > { %p47_p4 = scmp.ne.s32.totalorder %s525_s11, %s521_s10  ;;  %p48_p9 = scmp.eq.s32.totalorder %s537_s14, 0 }
  0x21   : > { %s749_s25 = smov (%p33_p6, %s31_s25), 0  ;;  %p345_p0 = scmp.lt.s32.totalorder %s537_s14, 2 }
  0x22   : > { %p640_p12 = por %p48_p9, %p47_p4  ;;  %p646_p13 = por %p597_p2, %p47_p4 }
  0x23   : > { %s35_s6 = ssub.s32 %s533_s13, %s749_s25  ;;  %s139_s7 = sand.u32 1, %s525_s11  }
  0x24   : > { %p38_p11 = scmp.eq.s32.totalorder %s35_s6, 0  ;;  %s313_s8 = sshll.u32 %s139_s7, 1 }
  0x25   : > { %s314_s16 = sshll.u32 %s533_s13, 5  ;;  %s143_s26 = scalar_lea.vmem [#allocation2], %s313_s8 }
  0x26   : > { %s655_s15 = scalar_select %p38_p11, %s525_s11, %s40_s3  }
  0x27   : > { %s149_s24 = scalar_lea.hbm %s727_s0, %s314_s16  ;;  %s151_s27 = sshll.u32 %s143_s26, 4  ;;  %s152_s27 = int_to_ptr.vmem [resolvable:$true] %s151_s27 }
  0x28   : > { %p663_p2 = pnand %p345_p0, %p640_p12  ;;  %s140_s28 = scalar_lea.sflag [#allocation3], %s139_s7 }
  0x29   : > { %s438_s29 = scalar_lea.vmem %s152_s27, 32  ;;  %s542_s30 = smov [#allocation2]  }
  0x2a   : > { %p427_p3 = pneg %p663_p2  ;;  %p439_p5 = scmp.ne.s32.totalorder %s152_s27, %s438_s29 }
  0x2b   : > { %s443_s3 = sshll.u32 %s542_s30, 4  ;;  %s444_s3 = int_to_ptr.vmem [resolvable:$false] %s443_s3 }
  0x2c   : > { %p441_p7 = pnand %p439_p5, %p427_p3  ;;  %s445_s6 = scalar_lea.vmem %s444_s3, 64 }
  0x2d   : > { %p446_p4 = scmp.lt.s32.totalorder %s152_s27, %s444_s3  ;;  %p447_p9 = scmp.lt.s32.totalorder %s445_s6, %s438_s29 }
  0x2e   : > { %p442_p6 = pneg %p441_p7 }
  0x2f   : > { %p448_p11 = por %p447_p9, %p446_p4 }
  0x31   : > { %p449_p10 = pnand %p448_p11, %p442_p6 }
  0x33   : > { %452 = shalt.err (!%p449_p10)
}
  0x34   : > { %339 = dma.hbm_to_vmem [thread:$0]  (!%p663_p2), %s149_s24, 32, %s152_s27, %s140_s28  }
  0x35   : > { %160 = sbr.rel (%p613_p8) target bundleno = 85 (0x55), region = 28  ;;  %s674_s4 = sand.u32 (!%p613_p8), 1, %s521_s10  }
  0x36   : > { %s316_s7 = sshll.u32 (!%p613_p8), %s674_s4, 1  ;;  %s163_s8 = scalar_lea.sflag (!%p613_p8), [#allocation3], %s674_s4 }
  0x37   : > { %s166_s16 = scalar_lea.vmem (!%p613_p8), [#allocation2], %s316_s7  ;;  %p740_p12 = scmp.ne.s32.totalorder (!%p613_p8), %s733_s19, 0 }
  0x3a   : > { %504 = dma.done.wait (%p740_p12), %s163_s8, 32  }
  0x3b   : > { %506 = vsyncadd (%p740_p12), %s163_s8, 4294967264 }
  0x3c   : > { %508 = dma.done.wait (%p593_p1), [#allocation6], 32  }
  0x3d   : > { %510 = vsyncadd (%p593_p1), [#allocation6], 4294967264  ;;  %s190_s21 = scalar_lea.vmem [#allocation7], %s316_s7  ;;  %s321_s23 = sshll.u32 %s529_s12, 5  ;;  %v193_v1 = vld [vmem:[%s166_s16] sm:$0x3] }
  0x3e   : > { %s217_s22 = sshll.u32 %s190_s21, 4  ;;  %s191_s24 = scalar_lea.vmem [#allocation5], %s529_s12  ;;  %s218_s22 = int_to_ptr.vmem [resolvable:$true] %s217_s22 }
  0x3f   : > { %v319_v0 = vld [vmem:[%s191_s24] ss:$0 sm:$0xff]  ;;  %s215_s27 = scalar_lea.hbm %s729_s2, %s321_s23  ;;  %s203_s18 = scalar_lea.sflag [#allocation4], %s674_s4 }
  0x40   : > { %v200_v2 = vmul.f32 %v319_v0, %v193_v1  ;;  %s453_s17 = scalar_lea.vmem %s218_s22, 32  ;;  %s543_s28 = smov [#allocation7]  }
  0x41   : > { %p454_p1 = scmp.ne.s32.totalorder %s218_s22, %s453_s17  ;;  %s457_s29 = sshll.u32 %s543_s28, 4  ;;  %s458_s29 = int_to_ptr.vmem [resolvable:$false] %s457_s29 }
  0x42   : > { %201 = vst [vmem:[%s190_s21] sm:$0x3] %v200_v2  ;;  %s459_s30 = scalar_lea.vmem %s458_s29, 64  ;;  %p460_p0 = scmp.lt.s32.totalorder %s218_s22, %s458_s29 }
  0x43   : > { %p455_p8 = pnand %p454_p1, %p646_p13  ;;  %p461_p2 = scmp.lt.s32.totalorder %s459_s30, %s453_s17 }
  0x45   : > { %p456_p10 = pneg %p455_p8  ;;  %p462_p3 = por %p461_p2, %p460_p0 }
  0x47   : > { %p463_p5 = pnand %p462_p3, %p456_p10 }
  0x49   : > { %466 = shalt.err (!%p463_p5)
}
  0x4a   : > { %s467_s12 = scalar_lea.hbm %s215_s27, 32  ;;  %s471_s4 = scalar_lea.hbm %s729_s2, 64 }
  0x4b   : > { %p468_p7 = scmp.ne.s32.totalorder %s215_s27, %s467_s12  ;;  %p472_p9 = scmp.lt.s32.totalorder %s215_s27, %s729_s2 }
  0x4c   : > { %p473_p11 = scmp.lt.s32.totalorder %s471_s4, %s467_s12 }
  0x4d   : > { %p469_p6 = pnand %p468_p7, %p646_p13 }
  0x4e   : > { %p474_p12 = por %p473_p11, %p472_p9 }
  0x4f   : > { %p470_p4 = pneg %p469_p6 }
  0x51   : > { %p475_p1 = pnand %p474_p12, %p470_p4 }
  0x53   : > { %478 = shalt.err (!%p475_p1)
}
  0x54   : > { %330 = dma.vmem_to_hbm [thread:$0]  (%p646_p13), %s218_s22, 32, %s215_s27, %s203_s18  }
  0x55 PF: > { %s229_s16 = sand.u32 1, %s517_s9   ;;  %p741_p8 = scmp.ne.s32.totalorder %s734_s20, 0 }
  0x56   : > { %p742_p10 = scmp.ge.s32.totalorder %s537_s14, 2  ;;  %s230_s21 = scalar_lea.sflag [#allocation4], %s229_s16 }
  0x58   : > { %p341_p0 = pnand %p742_p10, %p741_p8 }
  0x5a   : > { %p342_p2 = pneg %p341_p0 }
  0x5c   : > { %512 = dma.done.wait (%p342_p2), %s230_s21, 32  }
  0x5d   : > { %514 = vsyncadd (%p342_p2), %s230_s21, 4294967264  ;;  %s19_s14 = sadd.s32 1, %s537_s14   ;;  %s743_s9 = smov %s521_s10 }
  0x5e   : > { %p16_p3 = scmp.ge.s32.totalorder %s19_s14, 4   ;;  %s744_s10 = smov %s525_s11 }
  0x5f   : > { %s745_s11 = smov %s655_s15  ;;  %s746_s12 = smov %s533_s13 }
  0x60   : > { %s747_s13 = smov %s749_s25  ;;  %18 = sbr.rel (!%p16_p3) target bundleno = 7 (0x7), region = 78 }
  0x65   :  { %235 = vsyncpa [#allocation3], 1 }
  0x66   :  { %237 = vsyncpa [#allocation3 + $0x1], 1 }
  0x67   :  { %238 = vsyncpa [#allocation6], 1 }
  0x68   :  { %239 = vsyncpa [#allocation4], 1 }
  0x69   :  { %241 = vsyncpa [#allocation4 + $0x1], 1 }

</bundles_post_ra>
